<compile_context>
chip_gen: v7x
topology: tpu7x:2x2x1
jax: 0.10.0
libtpu: 0.0.40
codegen_flags: <defaults>
</compile_context>

<pallas_src>
import functools
import math

import jax
import jax.numpy as jnp
import numpy as np
from jax import lax
from jax.experimental import pallas as pl
from jax.experimental.pallas import tpu as pltpu

EPS = 1e-5  # PyTorch GroupNorm default


# ---------------------------------------------------------------------------
# Kernel
# ---------------------------------------------------------------------------
def _conv_gn_kernel(xT_ref, w_ref, b_ref, gamma_ref, beta_ref, grp_ref,
                    o_ref, s_ref, s2_ref, scale_ref, shift_ref,
                    *, hw_true, cpg):
    """Grid = (batch, channel_block, pass, hw_tile).

    pass 0: conv tile -> accumulate per-channel sum / sum-sq (streamed stats),
            finalize per-channel scale/shift on the last HW tile.
    pass 1: conv tile -> y * scale + shift -> lane-dense output tile.
    """
    p = pl.program_id(2)
    t = pl.program_id(3)
    n_t = pl.num_programs(3)

    # Convolution tile on the MXU: (C_blk, K) @ (K, hw_tile), f32 accumulation.
    y_t = jnp.dot(w_ref[...], xT_ref[0], preferred_element_type=jnp.float32)

    @pl.when(p == 0)
    def _stats_pass():
        @pl.when(t == 0)
        def _init():
            s_ref[...] = jnp.zeros_like(s_ref)
            s2_ref[...] = jnp.zeros_like(s2_ref)

        # Per-tile partial sums: cheap VPU/XLU work that overlaps the next
        # tile's DMA / MXU instead of a serial tail over the whole (C, HW).
        # (Padded HW columns are exactly zero, so they contribute nothing.)
        s_ref[...] += jnp.sum(y_t, axis=1, keepdims=True)
        s2_ref[...] += jnp.sum(y_t * y_t, axis=1, keepdims=True)

        @pl.when(t == n_t - 1)
        def _finalize_stats():
            hw_f = float(hw_true)               # true H_out*W_out (no padding)
            inv_cnt = 1.0 / (hw_f * cpg)
            b = b_ref[...]                      # (C_blk, 1)
            s = s_ref[...]
            s2 = s2_ref[...]
            # Bias folded analytically: z = y + b.
            s_tot = s + hw_f * b
            s2_tot = s2 + 2.0 * b * s + hw_f * (b * b)
            grp = grp_ref[...]                  # (C_blk, C_blk) same-group 1-hot
            mean_c = jnp.dot(grp, s_tot,
                             preferred_element_type=jnp.float32) * inv_cnt
            ex2_c = jnp.dot(grp, s2_tot,
                            preferred_element_type=jnp.float32) * inv_cnt
            var_c = jnp.maximum(ex2_c - mean_c * mean_c, 0.0)  # guard cancellation
            inv_c = lax.rsqrt(var_c + EPS)
            scale = inv_c * gamma_ref[...]
            scale_ref[...] = scale
            shift_ref[...] = (b - mean_c) * scale + beta_ref[...]

    @pl.when(p == 1)
    def _apply_pass():
        o_ref[0] = (y_t * scale_ref[...] + shift_ref[...]).astype(o_ref.dtype)


# ---------------------------------------------------------------------------
# Host-side helpers
# ---------------------------------------------------------------------------
def _im2col_T(x, kh, kw, stride, padding, dilation):
    """NCHW -> (N, C_in*KH*KW, H_out*W_out) matching PyTorch OIHW flattening."""
    n, cin, h, w = x.shape
    h_out = (h + 2 * padding - dilation * (kh - 1) - 1) // stride + 1
    w_out = (w + 2 * padding - dilation * (kw - 1) - 1) // stride + 1
    xp = jnp.pad(x, ((0, 0), (0, 0), (padding, padding), (padding, padding)))
    cols = []
    for i in range(kh):
        for j in range(kw):
            h0 = i * dilation
            w0 = j * dilation
            patch = xp[:, :,
                       h0:h0 + stride * (h_out - 1) + 1:stride,
                       w0:w0 + stride * (w_out - 1) + 1:stride]
            cols.append(patch)
    cols = jnp.stack(cols, axis=2)                         # (N, Cin, KH*KW, Ho, Wo)
    cols = cols.reshape(n, cin * kh * kw, h_out * w_out)   # K = ci*KH*KW + i*KW + j
    return cols, h_out, w_out


def _vmem_capacity_bytes():
    try:
        info = pltpu.get_tpu_info()
        cap = int(getattr(info, "vmem_capacity_bytes", 0))
        if cap > 0:
            return cap
    except Exception:
        pass
    return 64 << 20  # conservative fallback (v7x per-core physical VMEM)


def _round_up(x, m):
    return ((x + m - 1) // m) * m


def _pick_hw_tiling(hw, per_col_bytes, tile_budget_bytes):
    """(hw_tile, n_tiles): hw_tile is a multiple of 128, n_tiles*hw_tile >= hw."""
    hw128 = _round_up(hw, 128)
    max_fit = max(128, (tile_budget_bytes // max(per_col_bytes, 1)) // 128 * 128)
    t0 = min(max_fit, hw128, 8192)
    if hw128 >= 256:
        # keep at least two HW tiles so stats accumulation / epilogue pipeline.
        t0 = min(t0, max(128, _round_up(pl.cdiv(hw, 2), 128)))
    t0 = max(t0, 128)
    n_tiles = pl.cdiv(hw, t0)
    hw_tile = min(_round_up(pl.cdiv(hw, n_tiles), 128), t0)
    while n_tiles * hw_tile < hw:   # safety net; should not trigger
        n_tiles += 1
    return hw_tile, n_tiles


def _pick_channel_blocks(n_batch, cout, cpg):
    """Group-aligned channel split so both v7x TensorCores get work at batch=1."""
    if n_batch >= 2:
        return 1
    q = (cpg * 8) // math.gcd(cpg, 8)   # lcm(cpg, 8): group- and sublane-aligned
    return 2 if (cout % (2 * q) == 0) else 1


# ---------------------------------------------------------------------------
# Public entry point
# ---------------------------------------------------------------------------
def conv2d_groupnorm(x, weight, bias, gamma, beta, *,
                     stride=1, padding=1, dilation=1, n_groups=16,
                     out_dtype=None):
    """x: NCHW.  weight: (C_out, C_in, KH, KW) (PyTorch OIHW).  Returns NCHW.

    Pass out_dtype=jnp.bfloat16 to halve output HBM writeback (stats stay f32).
    """
    n, cin, _, _ = x.shape
    cout, _, kh, kw = weight.shape
    assert cout % n_groups == 0
    cpg = cout // n_groups
    out_dtype = x.dtype if out_dtype is None else out_dtype

    # bf16 before the im2col expansion so the KH*KW-fold copy moves half the bytes.
    xcolT, h_out, w_out = _im2col_T(x.astype(jnp.bfloat16),
                                    kh, kw, stride, padding, dilation)
    hw = h_out * w_out
    k = cin * kh * kw

    n_cblk = _pick_channel_blocks(n, cout, cpg)
    cblk = cout // n_cblk

    # ---- generation-aware tile / VMEM sizing ----
    in_bytes = 2                                  # bf16 matmul operands
    out_bytes = jnp.dtype(out_dtype).itemsize
    cap = _vmem_capacity_bytes()
    budget = max(24 << 20, min(int(0.70 * cap), cap - (16 << 20)))
    fixed_bytes = (2 * cblk * k * in_bytes        # weight (double-buffered)
                   + 2 * 3 * cblk * 4             # bias / gamma / beta
                   + 2 * cblk * cblk * 4          # same-group matrix
                   + 4 * cblk * 4                 # f32 stats/affine scratch
                   + (2 << 20))                   # compiler-internal slack
    per_col_bytes = 2 * k * in_bytes + 2 * cblk * out_bytes
    hw_tile, n_hw_tiles = _pick_hw_tiling(
        hw, per_col_bytes, max(budget - fixed_bytes, 1 << 20))
    hw_pad = hw_tile * n_hw_tiles

    if hw_pad != hw:
        xcolT = jnp.pad(xcolT, ((0, 0), (0, 0), (0, hw_pad - hw)))

    w_mat = weight.reshape(cout, k).astype(jnp.bfloat16)
    b_col = bias.reshape(cout, 1).astype(jnp.float32)
    gamma_col = gamma.reshape(cout, 1).astype(jnp.float32)
    beta_col = beta.reshape(cout, 1).astype(jnp.float32)

    # Same-group one-hot matrix (block-local; identical for every channel block
    # because channel blocks are aligned to group boundaries).
    ch = np.arange(cblk)
    grp_np = (ch[:, None] // cpg == ch[None, :] // cpg).astype(np.float32)
    grp_mat = jnp.asarray(grp_np)                 # (cblk, cblk)

    kernel = functools.partial(_conv_gn_kernel, hw_true=hw, cpg=cpg)

    # Advisory cost model (conv recomputed in both passes).
    flops = 4 * n * cout * hw_pad * k + 4 * n * cout * hw_pad
    bytes_accessed = (2 * n_cblk * n * k * hw_pad * in_bytes
                      + n * n_cblk * cblk * k * in_bytes
                      + n * cout * hw_pad * out_bytes
                      + 8 * cout * 4)
    cost = pl.CostEstimate(flops=int(flops), transcendentals=int(n * cout),
                           bytes_accessed=int(bytes_accessed))

    est = fixed_bytes + per_col_bytes * hw_tile
    hard_cap = min(int(0.85 * cap), cap - (8 << 20))   # leave physical headroom
    vmem_limit = int(min(max(32 << 20, int(est * 1.5)), hard_cap))

    grid = (n, n_cblk, 2, n_hw_tiles)

    out = pl.pallas_call(
        kernel,
        out_shape=jax.ShapeDtypeStruct((n, cout, hw_pad), out_dtype),
        grid_spec=pltpu.PrefetchScalarGridSpec(
            num_scalar_prefetch=0,
            grid=grid,
            in_specs=[
                pl.BlockSpec((1, k, hw_tile), lambda b, c, p, t: (b, 0, t)),
                pl.BlockSpec((cblk, k), lambda b, c, p, t: (c, 0)),
                pl.BlockSpec((cblk, 1), lambda b, c, p, t: (c, 0)),
                pl.BlockSpec((cblk, 1), lambda b, c, p, t: (c, 0)),
                pl.BlockSpec((cblk, 1), lambda b, c, p, t: (c, 0)),
                pl.BlockSpec((cblk, cblk), lambda b, c, p, t: (0, 0)),
            ],
            # Pass 0 (p==0) parks the output index on tile 0 (revisited, never
            # written, never flushed mid-pass); pass 1 (p==1) walks the tiles,
            # so each output tile is written to HBM exactly once.
            out_specs=pl.BlockSpec((1, cblk, hw_tile),
                                   lambda b, c, p, t: (b, c, t * p)),
            scratch_shapes=[pltpu.VMEM((cblk, 1), jnp.float32)] * 4,
        ),
        compiler_params=pltpu.CompilerParams(
            dimension_semantics=("parallel", "parallel", "arbitrary", "arbitrary"),
            vmem_limit_bytes=vmem_limit),
        cost_estimate=cost,
    )(xcolT, w_mat, b_col, gamma_col, beta_col, grp_mat)

    if hw_pad != hw:
        out = out[:, :, :hw]
    # (N, C_out, HW) -> NCHW is a pure reshape (no transpose).
    return out.reshape(n, cout, h_out, w_out)


# ---------------------------------------------------------------------------
# Pure-JAX reference (matches torch Conv2d + GroupNorm forward)
# ---------------------------------------------------------------------------
def _reference(x, weight, bias, gamma, beta, *, stride, padding, dilation, n_groups):
    y = lax.conv_general_dilated(
        x, weight, window_strides=(stride, stride),
        padding=[(padding, padding), (padding, padding)],
        rhs_dilation=(dilation, dilation),
        dimension_numbers=("NCHW", "OIHW", "NCHW"))
    y = y + bias.reshape(1, -1, 1, 1)
    n, c, h, w = y.shape
    r = y.reshape(n, n_groups, -1)
    mean = r.mean(-1, keepdims=True)
    var = r.var(-1, keepdims=True)
    rn = (r - mean) / jnp.sqrt(var + EPS)
    rn = rn.reshape(n, c, h, w)
    return rn * gamma.reshape(1, -1, 1, 1) + beta.reshape(1, -1, 1, 1)


if __name__ == "__main__":
    # Small config consistent with the module: in_channels=4, n_filters=32,
    # k_size=3, stride=1, padding=1, dilation=1, bias=True, n_groups=16.
    N, C_IN, H, W = 2, 4, 16, 16
    C_OUT, KH, KW = 32, 3, 3
    STRIDE, PAD, DIL, NG = 1, 1, 1, 16

    key = jax.random.PRNGKey(0)
    kx, kw_, kb, kg, kbt = jax.random.split(key, 5)

    x = jax.random.normal(kx, (N, C_IN, H, W), dtype=jnp.float32)
    fan_in = C_IN * KH * KW
    bound = 1.0 / np.sqrt(fan_in)
    weight = jax.random.uniform(kw_, (C_OUT, C_IN, KH, KW),
                                minval=-bound, maxval=bound, dtype=jnp.float32)
    bias = jax.random.uniform(kb, (C_OUT,), minval=-bound, maxval=bound,
                              dtype=jnp.float32)
    gamma = 1.0 + 0.1 * jax.random.normal(kg, (C_OUT,), dtype=jnp.float32)
    beta = 0.1 * jax.random.normal(kbt, (C_OUT,), dtype=jnp.float32)

    out = conv2d_groupnorm(x, weight, bias, gamma, beta,
                           stride=STRIDE, padding=PAD, dilation=DIL, n_groups=NG)
    out = jax.block_until_ready(out)

    ref = _reference(x, weight, bias, gamma, beta,
                     stride=STRIDE, padding=PAD, dilation=DIL, n_groups=NG)
    ref = jax.block_until_ready(ref)

    # Tolerance relaxed vs. pure-f32 because the conv matmul deliberately uses
    # bf16 MXU operands (f32 accumulation); errors are ~1e-3 after GroupNorm.
    np.testing.assert_allclose(np.asarray(out), np.asarray(ref),
                               rtol=2e-2, atol=2e-2)
    print("KERNEL_OK")
</pallas_src>

<mosaic_0001>
module attributes {stable_mosaic.version = 11 : i64} {
  func.func @_conv_gn_kernel(%arg0: i32, %arg1: i32, %arg2: i32, %arg3: i32, %arg4: memref<1x36x128xbf16, #tpu.memory_space<vmem>>, %arg5: memref<32x36xbf16, #tpu.memory_space<vmem>>, %arg6: memref<32x1xf32, #tpu.memory_space<vmem>>, %arg7: memref<32x1xf32, #tpu.memory_space<vmem>>, %arg8: memref<32x1xf32, #tpu.memory_space<vmem>>, %arg9: memref<32x32xf32, #tpu.memory_space<vmem>>, %arg10: memref<1x32x128xf32, #tpu.memory_space<vmem>>, %arg11: memref<32x1xf32, #tpu.memory_space<vmem>>, %arg12: memref<32x1xf32, #tpu.memory_space<vmem>>, %arg13: memref<32x1xf32, #tpu.memory_space<vmem>>, %arg14: memref<32x1xf32, #tpu.memory_space<vmem>>) attributes {dimension_semantics = [#tpu.dimension_semantics<parallel>, #tpu.dimension_semantics<parallel>, #tpu.dimension_semantics<arbitrary>, #tpu.dimension_semantics<arbitrary>], iteration_bounds = array<i64: 2, 1, 2, 2>, scalar_prefetch = 0 : i64, scratch_operands = 4 : i64, tpu.core_type = #tpu.core_type<tc>, window_params = [{transform_indices = @transform_0, window_bounds = array<i64: 1, 36, 128>}, {transform_indices = @transform_1, window_bounds = array<i64: 32, 36>}, {transform_indices = @transform_2, window_bounds = array<i64: 32, 1>}, {transform_indices = @transform_3, window_bounds = array<i64: 32, 1>}, {transform_indices = @transform_4, window_bounds = array<i64: 32, 1>}, {pipeline_mode = #tpu.pipeline_mode<synchronous>, transform_indices = @transform_5, window_bounds = array<i64: 32, 32>}, {transform_indices = @transform_6, window_bounds = array<i64: 1, 32, 128>}]} {
    %c0 = arith.constant 0 : index
    %c0_0 = arith.constant 0 : index
    %0 = vector.load %arg5[%c0, %c0_0] : memref<32x36xbf16, #tpu.memory_space<vmem>>, vector<32x36xbf16>
    %c0_1 = arith.constant 0 : index
    %c0_2 = arith.constant 0 : index
    %c0_3 = arith.constant 0 : index
    %1 = vector.load %arg4[%c0_1, %c0_2, %c0_3] : memref<1x36x128xbf16, #tpu.memory_space<vmem>>, vector<1x36x128xbf16>
    %2 = vector.shape_cast %1 : vector<1x36x128xbf16> to vector<36x128xbf16>
    %cst = arith.constant dense<0.000000e+00> : vector<32x128xf32>
    %3 = tpu.matmul %0, %2, %cst {dimension_numbers = #tpu.dot_dimension_numbers<[1], [0], [0], [1], [0, 0, 1, 1], [], []>} : vector<32x36xbf16>, vector<36x128xbf16>, vector<32x128xf32> -> vector<32x128xf32>
    %c0_i32 = arith.constant 0 : i32
    %4 = arith.cmpi eq, %arg2, %c0_i32 : i32
    %5 = arith.extui %4 : i1 to i32
    %c0_i32_4 = arith.constant 0 : i32
    %6 = arith.cmpi ne, %5, %c0_i32_4 : i32
    scf.if %6 {
      %c0_i32_6 = arith.constant 0 : i32
      %10 = arith.cmpi eq, %arg3, %c0_i32_6 : i32
      %11 = arith.extui %10 : i1 to i32
      %c0_i32_7 = arith.constant 0 : i32
      %12 = arith.cmpi ne, %11, %c0_i32_7 : i32
      scf.if %12 {
        %cst_20 = arith.constant 0.000000e+00 : f32
        %27 = vector.broadcast %cst_20 : f32 to vector<32x1xf32>
        %c0_21 = arith.constant 0 : index
        %c0_22 = arith.constant 0 : index
        %28 = vector.load %arg11[%c0_21, %c0_22] : memref<32x1xf32, #tpu.memory_space<vmem>>, vector<32x1xf32>
        tpu.vector_store %arg11[%c0_21, %c0_22], %27 {strides = array<i32>} : memref<32x1xf32, #tpu.memory_space<vmem>>, vector<32x1xf32>,
        %cst_23 = arith.constant 0.000000e+00 : f32
        %29 = vector.broadcast %cst_23 : f32 to vector<32x1xf32>
        %c0_24 = arith.constant 0 : index
        %c0_25 = arith.constant 0 : index
        %30 = vector.load %arg12[%c0_24, %c0_25] : memref<32x1xf32, #tpu.memory_space<vmem>>, vector<32x1xf32>
        tpu.vector_store %arg12[%c0_24, %c0_25], %29 {strides = array<i32>} : memref<32x1xf32, #tpu.memory_space<vmem>>, vector<32x1xf32>,
      } else {
      }
      %c0_8 = arith.constant 0 : index
      %c0_9 = arith.constant 0 : index
      %13 = vector.load %arg11[%c0_8, %c0_9] : memref<32x1xf32, #tpu.memory_space<vmem>>, vector<32x1xf32>
      %cst_10 = arith.constant dense<0.000000e+00> : vector<32xf32>
      %14 = vector.multi_reduction <add>, %3, %cst_10 [1] : vector<32x128xf32> to vector<32xf32>
      %15 = vector.shape_cast %14 : vector<32xf32> to vector<32x1xf32>
      %16 = arith.addf %13, %15 : vector<32x1xf32>
      %c0_11 = arith.constant 0 : index
      %c0_12 = arith.constant 0 : index
      %17 = vector.load %arg11[%c0_11, %c0_12] : memref<32x1xf32, #tpu.memory_space<vmem>>, vector<32x1xf32>
      tpu.vector_store %arg11[%c0_11, %c0_12], %16 {strides = array<i32>} : memref<32x1xf32, #tpu.memory_space<vmem>>, vector<32x1xf32>,
      %c0_13 = arith.constant 0 : index
      %c0_14 = arith.constant 0 : index
      %18 = vector.load %arg12[%c0_13, %c0_14] : memref<32x1xf32, #tpu.memory_space<vmem>>, vector<32x1xf32>
      %19 = arith.mulf %3, %3 : vector<32x128xf32>
      %cst_15 = arith.constant dense<0.000000e+00> : vector<32xf32>
      %20 = vector.multi_reduction <add>, %19, %cst_15 [1] : vector<32x128xf32> to vector<32xf32>
      %21 = vector.shape_cast %20 : vector<32xf32> to vector<32x1xf32>
      %22 = arith.addf %18, %21 : vector<32x1xf32>
      %c0_16 = arith.constant 0 : index
      %c0_17 = arith.constant 0 : index
      %23 = vector.load %arg12[%c0_16, %c0_17] : memref<32x1xf32, #tpu.memory_space<vmem>>, vector<32x1xf32>
      tpu.vector_store %arg12[%c0_16, %c0_17], %22 {strides = array<i32>} : memref<32x1xf32, #tpu.memory_space<vmem>>, vector<32x1xf32>,
      %c1_i32_18 = arith.constant 1 : i32
      %24 = arith.cmpi eq, %arg3, %c1_i32_18 : i32
      %25 = arith.extui %24 : i1 to i32
      %c0_i32_19 = arith.constant 0 : i32
      %26 = arith.cmpi ne, %25, %c0_i32_19 : i32
      scf.if %26 {
        %c0_20 = arith.constant 0 : index
        %c0_21 = arith.constant 0 : index
        %27 = vector.load %arg6[%c0_20, %c0_21] : memref<32x1xf32, #tpu.memory_space<vmem>>, vector<32x1xf32>
        %c0_22 = arith.constant 0 : index
        %c0_23 = arith.constant 0 : index
        %28 = vector.load %arg11[%c0_22, %c0_23] : memref<32x1xf32, #tpu.memory_space<vmem>>, vector<32x1xf32>
        %c0_24 = arith.constant 0 : index
        %c0_25 = arith.constant 0 : index
        %29 = vector.load %arg12[%c0_24, %c0_25] : memref<32x1xf32, #tpu.memory_space<vmem>>, vector<32x1xf32>
        %cst_26 = arith.constant 2.560000e+02 : f32
        %30 = vector.broadcast %cst_26 : f32 to vector<32x1xf32>
        %31 = arith.mulf %30, %27 : vector<32x1xf32>
        %32 = arith.addf %28, %31 : vector<32x1xf32>
        %cst_27 = arith.constant 2.000000e+00 : f32
        %33 = vector.broadcast %cst_27 : f32 to vector<32x1xf32>
        %34 = arith.mulf %33, %27 : vector<32x1xf32>
        %35 = arith.mulf %34, %28 : vector<32x1xf32>
        %36 = arith.addf %29, %35 : vector<32x1xf32>
        %37 = arith.mulf %27, %27 : vector<32x1xf32>
        %cst_28 = arith.constant 2.560000e+02 : f32
        %38 = vector.broadcast %cst_28 : f32 to vector<32x1xf32>
        %39 = arith.mulf %38, %37 : vector<32x1xf32>
        %40 = arith.addf %36, %39 : vector<32x1xf32>
        %c0_29 = arith.constant 0 : index
        %c0_30 = arith.constant 0 : index
        %41 = vector.load %arg9[%c0_29, %c0_30] : memref<32x32xf32, #tpu.memory_space<vmem>>, vector<32x32xf32>
        %cst_31 = arith.constant dense<0.000000e+00> : vector<32x1xf32>
        %42 = tpu.matmul %41, %32, %cst_31 {dimension_numbers = #tpu.dot_dimension_numbers<[1], [0], [0], [1], [0, 0, 1, 1], [], []>} : vector<32x32xf32>, vector<32x1xf32>, vector<32x1xf32> -> vector<32x1xf32>
        %cst_32 = arith.constant 0.001953125 : f32
        %43 = vector.broadcast %cst_32 : f32 to vector<32x1xf32>
        %44 = arith.mulf %42, %43 : vector<32x1xf32>
        %cst_33 = arith.constant dense<0.000000e+00> : vector<32x1xf32>
        %45 = tpu.matmul %41, %40, %cst_33 {dimension_numbers = #tpu.dot_dimension_numbers<[1], [0], [0], [1], [0, 0, 1, 1], [], []>} : vector<32x32xf32>, vector<32x1xf32>, vector<32x1xf32> -> vector<32x1xf32>
        %cst_34 = arith.constant 0.001953125 : f32
        %46 = vector.broadcast %cst_34 : f32 to vector<32x1xf32>
        %47 = arith.mulf %45, %46 : vector<32x1xf32>
        %48 = arith.mulf %44, %44 : vector<32x1xf32>
        %49 = arith.subf %47, %48 : vector<32x1xf32>
        %cst_35 = arith.constant 0.000000e+00 : f32
        %50 = vector.broadcast %cst_35 : f32 to vector<32x1xf32>
        %51 = arith.maximumf %49, %50 : vector<32x1xf32>
        %cst_36 = arith.constant 9.99999974E-6 : f32
        %52 = vector.broadcast %cst_36 : f32 to vector<32x1xf32>
        %53 = arith.addf %51, %52 : vector<32x1xf32>
        %54 = math.rsqrt %53 : vector<32x1xf32>
        %c0_37 = arith.constant 0 : index
        %c0_38 = arith.constant 0 : index
        %55 = vector.load %arg7[%c0_37, %c0_38] : memref<32x1xf32, #tpu.memory_space<vmem>>, vector<32x1xf32>
        %56 = arith.mulf %54, %55 : vector<32x1xf32>
        %c0_39 = arith.constant 0 : index
        %c0_40 = arith.constant 0 : index
        %57 = vector.load %arg13[%c0_39, %c0_40] : memref<32x1xf32, #tpu.memory_space<vmem>>, vector<32x1xf32>
        tpu.vector_store %arg13[%c0_39, %c0_40], %56 {strides = array<i32>} : memref<32x1xf32, #tpu.memory_space<vmem>>, vector<32x1xf32>,
        %58 = arith.subf %27, %44 : vector<32x1xf32>
        %59 = arith.mulf %58, %56 : vector<32x1xf32>
        %c0_41 = arith.constant 0 : index
        %c0_42 = arith.constant 0 : index
        %60 = vector.load %arg8[%c0_41, %c0_42] : memref<32x1xf32, #tpu.memory_space<vmem>>, vector<32x1xf32>
        %61 = arith.addf %59, %60 : vector<32x1xf32>
        %c0_43 = arith.constant 0 : index
        %c0_44 = arith.constant 0 : index
        %62 = vector.load %arg14[%c0_43, %c0_44] : memref<32x1xf32, #tpu.memory_space<vmem>>, vector<32x1xf32>
        tpu.vector_store %arg14[%c0_43, %c0_44], %61 {strides = array<i32>} : memref<32x1xf32, #tpu.memory_space<vmem>>, vector<32x1xf32>,
      } else {
      }
    } else {
    }
    %c1_i32 = arith.constant 1 : i32
    %7 = arith.cmpi eq, %arg2, %c1_i32 : i32
    %8 = arith.extui %7 : i1 to i32
    %c0_i32_5 = arith.constant 0 : i32
    %9 = arith.cmpi ne, %8, %c0_i32_5 : i32
    scf.if %9 {
      %c0_6 = arith.constant 0 : index
      %c0_7 = arith.constant 0 : index
      %10 = vector.load %arg13[%c0_6, %c0_7] : memref<32x1xf32, #tpu.memory_space<vmem>>, vector<32x1xf32>
      %11 = vector.broadcast %10 : vector<32x1xf32> to vector<32x128xf32>
      %12 = arith.mulf %3, %11 : vector<32x128xf32>
      %c0_8 = arith.constant 0 : index
      %c0_9 = arith.constant 0 : index
      %13 = vector.load %arg14[%c0_8, %c0_9] : memref<32x1xf32, #tpu.memory_space<vmem>>, vector<32x1xf32>
      %14 = vector.broadcast %13 : vector<32x1xf32> to vector<32x128xf32>
      %15 = arith.addf %12, %14 : vector<32x128xf32>
      %c0_10 = arith.constant 0 : index
      %c0_11 = arith.constant 0 : index
      %c0_12 = arith.constant 0 : index
      %16 = vector.load %arg10[%c0_10, %c0_11, %c0_12] : memref<1x32x128xf32, #tpu.memory_space<vmem>>, vector<1x32x128xf32>
      %17 = vector.shape_cast %16 : vector<1x32x128xf32> to vector<32x128xf32>
      %18 = vector.shape_cast %15 : vector<32x128xf32> to vector<1x32x128xf32>
      tpu.vector_store %arg10[%c0_10, %c0_11, %c0_12], %18 {strides = array<i32>} : memref<1x32x128xf32, #tpu.memory_space<vmem>>, vector<1x32x128xf32>,
    } else {
    }
    return
  }
  func.func @transform_0(%arg0: i32, %arg1: i32, %arg2: i32, %arg3: i32) -> (i32, i32, i32) {
    %c0_i32 = arith.constant 0 : i32
    %c0_i32_0 = arith.constant 0 : i32
    return %arg0, %c0_i32, %arg3 : i32, i32, i32
  }
  func.func @transform_1(%arg0: i32, %arg1: i32, %arg2: i32, %arg3: i32) -> (i32, i32) {
    %c0_i32 = arith.constant 0 : i32
    %c0_i32_0 = arith.constant 0 : i32
    return %arg1, %c0_i32 : i32, i32
  }
  func.func @transform_2(%arg0: i32, %arg1: i32, %arg2: i32, %arg3: i32) -> (i32, i32) {
    %c0_i32 = arith.constant 0 : i32
    %c0_i32_0 = arith.constant 0 : i32
    return %arg1, %c0_i32 : i32, i32
  }
  func.func @transform_3(%arg0: i32, %arg1: i32, %arg2: i32, %arg3: i32) -> (i32, i32) {
    %c0_i32 = arith.constant 0 : i32
    %c0_i32_0 = arith.constant 0 : i32
    return %arg1, %c0_i32 : i32, i32
  }
  func.func @transform_4(%arg0: i32, %arg1: i32, %arg2: i32, %arg3: i32) -> (i32, i32) {
    %c0_i32 = arith.constant 0 : i32
    %c0_i32_0 = arith.constant 0 : i32
    return %arg1, %c0_i32 : i32, i32
  }
  func.func @transform_5(%arg0: i32, %arg1: i32, %arg2: i32, %arg3: i32) -> (i32, i32) {
    %c0_i32 = arith.constant 0 : i32
    %c0_i32_0 = arith.constant 0 : i32
    %c0_i32_1 = arith.constant 0 : i32
    return %c0_i32, %c0_i32_0 : i32, i32
  }
  func.func @transform_6(%arg0: i32, %arg1: i32, %arg2: i32, %arg3: i32) -> (i32, i32, i32) {
    %0 = arith.muli %arg3, %arg2 : i32
    %c0_i32 = arith.constant 0 : i32
    return %arg0, %arg1, %0 : i32, i32, i32
  }
}

</mosaic_0001>

<bundles_post_ra>
// kernel: tpu_custom_call.1
= control target key start
LH: loop header
LB: loop body
LE: loop exit
PB: predicated region body
PF: predicated region fallthrough
CT: control target
= control target key end

     0   :  { %s1868_s0 = inlined_call_operand.vmem [shape: bf16[2,36,256], index: 0, kind: input, shape index: {}]   ;;  %s1869_s1 = inlined_call_operand.vmem [shape: bf16[32,36], index: 1, kind: input, shape index: {}]   ;;  %s1870_s2 = inlined_call_operand.vmem [shape: f32[32,1], index: 2, kind: input, shape index: {}]   ;;  %s1871_s3 = inlined_call_operand.vmem [shape: f32[32,1], index: 3, kind: input, shape index: {}]   ;;  %s1872_s4 = inlined_call_operand.vmem [shape: f32[32,1], index: 4, kind: input, shape index: {}]   ;;  %s1873_s5 = inlined_call_operand.vmem [shape: f32[32,32], index: 5, kind: input, shape index: {}]   ;;  %s1874_s6 = inlined_call_operand.hbm [shape: f32[2,32,256], index: 6, kind: output, shape index: {}]  }
   0x1   :  { %1880 = sst [smem:[#allocation13_spill]] %s1868_s0 }
   0x2   :  { %1881 = sst [smem:[#allocation14_spill]] %s1869_s1 }
   0x3   :  { %1882 = sst [smem:[#allocation15_spill]] %s1870_s2 }
   0x4   :  { %1883 = sst [smem:[#allocation16_spill]] %s1871_s3 }
   0x5   :  { %1884 = sst [smem:[#allocation17_spill]] %s1872_s4 }
   0x6   :  { %1885 = sst [smem:[#allocation18_spill]] %s1873_s5 }
   0x7   :  { %1886 = sst [smem:[#allocation19_spill]] %s1874_s6 }
   0x8   :  { %11 = vsyncpa [#allocation8], 0 }
   0x9   :  { %13 = vsyncpa [#allocation8 + $0x1], 0  ;;  %s1528_s21 = smov 0   ;;  %s1530_s22 = smov 0  }
   0xa   :  { %s1532_s23 = smov 0   ;;  %s1534_s24 = smov 0  }
   0xb   :  { %s1536_s25 = smov 0   ;;  %s1538_s26 = smov 0  }
   0xc   :  { %s1540_s27 = smov 0   ;;  %s1542_s28 = smov 0  }
   0xd   :  { %s1544_s29 = smov 0   ;;  %s1546_s30 = smov 0  }
   0xe   :  { %s1548_s7 = smov 0   ;;  %s1550_s8 = smov 0  }
   0xf LB: > { %1887 = sst [smem:[#allocation10_spill]] %s1469_s28  ;;  %s1122_s9 = sadd.s32 4294967295, %s1485_s8   ;;  %s1485_s8 = sphi %s1550_s8, %s19_s8   ;;  %s1481_s7 = sphi %s1548_s7, %s1913_s7   ;;  %s1477_s30 = sphi %s1546_s30, %s1904_s30   ;;  %s1473_s29 = sphi %s1544_s29, %s1912_s29   ;;  %s1469_s28 = sphi %s1542_s28, %s1911_s28   ;;  %s1465_s27 = sphi %s1540_s27, %s1903_s27   ;;  %s1461_s26 = sphi %s1538_s26, %s1910_s26   ;;  %s1457_s25 = sphi %s1536_s25, %s1909_s25   ;;  %s1453_s24 = sphi %s1534_s24, %s1908_s24   ;;  %s1449_s23 = sphi %s1532_s23, %s1907_s23   ;;  %s1445_s22 = sphi %s1530_s22, %s1906_s22   ;;  %s1441_s21 = sphi %s1528_s21, %s1905_s21  }
  0x10   : > { %1888 = sst [smem:[#allocation11_spill]] %s1477_s30  ;;  %s1123_s10 = sadd.s32 4294967294, %s1485_s8  }
  0x11   : > { %s34_s11 = sadd.s32 1, %s1473_s29  ;;  %s37_s12 = sadd.s32 1, %s1477_s30 }
  0x12   : > { %p35_p0 = scmp.ge.s32.totalorder %s34_s11, 2  ;;  %s45_s13 = sadd.s32 1, %s1481_s7 }
  0x13   : > { %p61_p1 = scmp.ne.s32.totalorder %s1457_s25, %s1453_s24  ;;  %s54_s14 = sadd.s32 1, %s1457_s25 }
  0x14   : > { %s1915_s11 = smov (%p35_p0, %s34_s11), 0  ;;  %s1917_s12 = smov (!%p35_p0, %s37_s12), %s1477_s30 }
  0x15   : > { %p62_p2 = scmp.eq.s32.totalorder %s1485_s8, 0  ;;  %p39_p3 = scmp.ge.s32.totalorder %s1917_s12, 2 }
  0x16   : > { %s50_s15 = ssub.s32 %s1473_s29, %s1915_s11  ;;  %s202_s17 = smul.u32 %s1473_s29, %s1477_s30 }
  0x17   : > { %p1602_p4 = por %p62_p2, %p61_p1  ;;  %s1919_s12 = smov (%p39_p3, %s1917_s12), 0 }
  0x18   : > { %1890 = sst [smem:[#allocation12_spill]] %s1919_s12  ;;  %s1921_s13 = smov (!%p39_p3, %s45_s13), %s1481_s7 }
  0x19   : > { %s203_s18 = smul.u32 %s1919_s12, %s1915_s11  ;;  %p221_p5 = scmp.ne.s32.totalorder %s1449_s23, %s1445_s22 }
  0x1a   : > { %p47_p6 = scmp.ge.s32.totalorder %s1921_s13, 2  ;;  %p222_p7 = scmp.eq.s32.totalorder %s1122_s9, 7 }
  0x1b   : > { %s207_s19 = ssub.s32 %s202_s17, %s203_s18  ;;  %p227_p8 = scmp.ne.s32.totalorder %s1445_s22, %s1441_s21 }
  0x1c   : > { %s1923_s13 = smov (%p47_p6, %s1921_s13), 0  ;;  %p1619_p9 = por %p222_p7, %p221_p5 }
  0x1d   : > { %p228_p10 = scmp.eq.s32.totalorder %s1123_s10, 7  ;;  %s49_s30 = ssub.s32 %s1481_s7, %s1923_s13 }
  0x1e   : > { %s211_s6 = sadd.s32 1, %s1449_s23  ;;  %s51_s28 = sor.u32 %s50_s15, %s49_s30 }
  0x1f   : > { %s208_s4 = sor.u32 %s207_s19, %s49_s30  ;;  %p52_p11 = scmp.eq.s32.totalorder %s51_s28, 0 }
  0x20   : > { %p209_p12 = scmp.eq.s32.totalorder %s208_s4, 0  ;;  %p1626_p13 = por %p228_p10, %p227_p8 }
  0x21   : > { %s1631_s9 = scalar_select %p52_p11, %s1457_s25, %s54_s14  }
  0x22   : > { %s1634_s17 = scalar_select %p209_p12, %s1449_s23, %s211_s6  }
  0x23   : > { %p1129_p0 = scmp.ge.s32.totalorder %s1485_s8, 8 }
  0x25   : > { %283 = sbr.rel (%p1129_p0) target bundleno = 56 (0x38), region = 36 }
  0x2c   : > { %286 = sbr.rel (!%p1602_p4) target bundleno = 56 (0x38), region = 40  ;;  %s288_s30 = sand.u32 (%p1602_p4), 1, %s1457_s25  }
  0x2d   : > { %s1234_s28 = smul.u32 (%p1602_p4), 10, %s1481_s7  ;;  %s1893_s0 = sld [smem:[#allocation13_spill]] (%p1602_p4) }
  0x2e   : > { %s1233_s4 = smul.u32 (%p1602_p4), 20, %s288_s30 }
  0x2f   : > { %s292_s10 = sadd.s32 (%p1602_p4), %s1473_s29, %s1234_s28 }
  0x30   : > { %s1130_s15 = sshll.u32 (%p1602_p4), %s292_s10, 2  ;;  %s290_s6 = scalar_lea.vmem (%p1602_p4), [#allocation6], %s1233_s4 }
  0x33   : > { %s294_s14 = scalar_lea.vmem %s1893_s0, %s1130_s15 }
  0x34   : > { %v310_v0 = vld [vmem:[%s294_s14] sm:$0xf]  ;;  %v312_v1 = vld [vmem:[%s294_s14 + $0x8] sm:$0xf]  ;;  %v314_v2 = vld [vmem:[%s294_s14 + $0x10] sm:$0xf] }
  0x35   : > { %311 = vst [vmem:[%s290_s6] sm:$0xf] %v310_v0  ;;  %313 = vst [vmem:[%s290_s6 + $0x4] sm:$0xf] %v312_v1  ;;  %v316_v3 = vld [vmem:[%s294_s14 + $0x18] sm:$0xf] }
  0x36   : > { %315 = vst [vmem:[%s290_s6 + $0x8] sm:$0xf] %v314_v2  ;;  %v318_v4 = vld [vmem:[%s294_s14 + $0x20] sm:$0xf]  ;;  %317 = vst [vmem:[%s290_s6 + $0xc] sm:$0xf] %v316_v3 }
  0x37   : > { %319 = vst [vmem:[%s290_s6 + $0x10] sm:$0xf] %v318_v4 }
  0x38 PF: > { %p1131_p1 = scmp.ge.s32.totalorder %s1485_s8, 1  ;;  %p351_p2 = scmp.lt.s32.totalorder %s1485_s8, 9 }
  0x3a   : > { %p352_p3 = pnand %p1131_p1, %p351_p2 }
  0x3b   : > { %s358_s16 = sand.u32 (!%p352_p3), 1, %s1453_s24   ;;  %s1879_s30 = sand.u32 (!%p352_p3), 1, %s1445_s22   ;;  %vm468_vm0 = vcmask (!%p352_p3), 293888   ;;  %vm475_vm1 = vcmask (!%p352_p3), 1041408  }
  0x3c   : > { %355 = sbr.rel (%p352_p3) target bundleno = 893 (0x37d), region = 81  ;;  %s1894_s1 = sld [smem:[#allocation14_spill]] (!%p352_p3) }
  0x3d   : > { %s1235_s10 = smul.u32 (!%p352_p3), 20, %s358_s16  ;;  %s1132_s15 = sshll.u32 (!%p352_p3), %s1879_s30, 5 }
  0x3e   : > { %s1665_s14 = scalar_lea.vmem (!%p352_p3), [#allocation7], %s1132_s15  ;;  %p1140_p4 = scmp.ne.s32.totalorder (!%p352_p3), %s1465_s27, 0 }
  0x3f   : > { %s360_s18 = scalar_lea.vmem (!%p352_p3), [#allocation6], %s1235_s10 }
  0x40   : > { %v1344_v6 = vld [vmem:[%s360_s18] sm:$0xff] (!%p352_p3)   ;;  %v1345_v7 = vld [vmem:[%s360_s18 + $0x8] sm:$0xff] (!%p352_p3)   ;;  %v1346_v8 = vld [vmem:[%s360_s18 + $0x10] ss:$0 sps:$4 sm:$0x33] (!%p352_p3)  }
  0x41   : > { %1178 = vmatprep.subr.bf16.mxu0 (!%p352_p3), %v1344_v6  ;;  %v477_v9 = vsel (!%p352_p3), %vm475_vm1, %v1346_v8, 0 }
  0x42   : > { %v1347_v5 = vld [vmem:[%s1894_s1] sm:$0xff] (!%p352_p3)   ;;  %1179 = vmatpush3.bf16.msra.mxu0 (!%p352_p3), %v1344_v6  ;;  %v1348_v10 = vld [vmem:[%s1894_s1 + $0x8] sm:$0xff] (!%p352_p3)  }
  0x43   : > { %1184 = vmatprep.mubr.msk.bf16.mxu0 %vm468_vm0, %v1347_v5  ;;  %1180 = vmatprep.subr.bf16.mxu0 %v1345_v7  ;;  %p1141_p5 = scmp.ne.s32.totalorder (!%p1140_p4), %s1461_s26, 0 }
  0x46   : > { %1181 = vmatpush3.bf16.msra.mxu0 %v1345_v7 }
  0x47   : > { %1232 = vmatprep.subr.msk.bf16.mxu0 %vm475_vm1, %v1346_v8 }
  0x4a   : > { %1183 = vmatpush3.bf16.msra.mxu0 %v477_v9 }
  0x4d   : > { %1185 = vmatmul.mubr.msk.bf16.vlgmr.msra.gmra.mrb[0].mxu0 %vm468_vm0, %v1348_v10 }
 0x11d   : > { %531 = sbr.rel (%p1140_p4) target bundleno = 716 (0x2cc), region = 89 }
 0x120   : > { %v1657_v11 = vpop.f32.mrb[0].mxu0 }
 0x121   : > { %v1659_v12 = vpop.f32.mrb[1].mxu0 }
 0x122   : > { %v1661_v13 = vpop.f32.mrb[2].mxu0 }
 0x123   : > { %v1663_v14 = vpop.f32.mrb[3].mxu0 }
 0x124   : > { %535 = sbr.rel (%p1141_p5) target bundleno = 299 (0x12b), region = 93  ;;  %vm536_vm2 = vcmask (!%p1141_p5), 7168   ;;  %v1487_v15 = vmov (!%p1141_p5), 0.0  }
 0x125   : > { %537 = vst.msk [vmem:[#allocation2] sm:$0xff] (!%p1141_p5), %vm536_vm2, %v1487_v15  ;;  %538 = vst.msk [vmem:[#allocation2 + $0x8] sm:$0xff] (!%p1141_p5), %vm536_vm2, %v1487_v15 }
 0x126   : > { %539 = vst.msk [vmem:[#allocation2 + $0x10] sm:$0xff] (!%p1141_p5), %vm536_vm2, %v1487_v15  ;;  %540 = vst.msk [vmem:[#allocation2 + $0x18] sm:$0xff] (!%p1141_p5), %vm536_vm2, %v1487_v15 }
 0x127   : > { %541 = vst.msk [vmem:[#allocation3] sm:$0xff] (!%p1141_p5), %vm536_vm2, %v1487_v15  ;;  %542 = vst.msk [vmem:[#allocation3 + $0x8] sm:$0xff] (!%p1141_p5), %vm536_vm2, %v1487_v15 }
 0x128   : > { %543 = vst.msk [vmem:[#allocation3 + $0x10] sm:$0xff] (!%p1141_p5), %vm536_vm2, %v1487_v15  ;;  %544 = vst.msk [vmem:[#allocation3 + $0x18] sm:$0xff] (!%p1141_p5), %vm536_vm2, %v1487_v15 }
 0x12b PF: > { %553 = vadd.xlane.f32.xlu1 %v1657_v11  ;;  %549 = vadd.xlane.f32.xlu0 %v1659_v12  ;;  %v571_v16 = vmul.f32 %v1663_v14, %v1663_v14  ;;  %v570_v17 = vmul.f32 %v1659_v12, %v1659_v12  ;;  %v573_v18 = vmul.f32 %v1661_v13, %v1661_v13  ;;  %vm561_vm3 = vcmask 7168   ;;  %p1142_p6 = scmp.ne.s32.totalorder %s1461_s26, 1 }
 0x12c   : > { %v572_v19 = vmul.f32 %v1657_v11, %v1657_v11  ;;  %v545_v21 = vld [vmem:[#allocation2] sm:$0xff]  ;;  %v546_v27 = vld [vmem:[#allocation2 + $0x8] sm:$0xff]  ;;  %s1895_s2 = sld [smem:[#allocation15_spill]] (!%p1142_p6)  ;;  %vm642_vm4 = vcmask (!%p1142_p6), 261120   ;;  %s1896_s5 = sld [smem:[#allocation18_spill]] (!%p1142_p6) }
 0x12d   : > { %v547_v20 = vld [vmem:[#allocation2 + $0x10] sm:$0xff]  ;;  %v548_v26 = vld [vmem:[#allocation2 + $0x18] sm:$0xff]  ;;  %s1897_s3 = sld [smem:[#allocation16_spill]] (!%p1142_p6)  ;;  %s1898_s10 = sld [smem:[#allocation17_spill]] (!%p1142_p6) }
 0x12e   : > { %v567_v32 = vld [vmem:[#allocation3 + $0x8] sm:$0xff]  ;;  %v566_v33 = vld [vmem:[#allocation3] sm:$0xff] }
 0x12f   : > { %555 = vadd.xlane.f32.xlu1 %v1661_v13  ;;  %551 = vadd.xlane.f32.xlu0 %v1663_v14  ;;  %v569_v38 = vld [vmem:[#allocation3 + $0x18] sm:$0xff]  ;;  %v568_v39 = vld [vmem:[#allocation3 + $0x10] sm:$0xff] }
 0x132   : > { %v1693_v44 = vld [vmem:[%s1895_s2] sm:$0xff] (!%p1142_p6)  ;;  %v1698_v45 = vld [vmem:[%s1895_s2 + $0x8] sm:$0xff] (!%p1142_p6)  ;;  %v1711_v56 = vld [vmem:[%s1895_s2 + $0x10] sm:$0xff] (!%p1142_p6) }
 0x133   : > { %576 = vadd.xlane.f32.xlu1 %v571_v16  ;;  %574 = vadd.xlane.f32.xlu0 %v570_v17  ;;  %v606_v48 = vmul.f32 (!%p1142_p6), 256.0, %v1693_v44  ;;  %v607_v49 = vmul.f32 (!%p1142_p6), 256.0, %v1698_v45  ;;  %v614_v50 = vmul.f32 (!%p1142_p6), 2.0, %v1693_v44  ;;  %v615_v51 = vmul.f32 (!%p1142_p6), 2.0, %v1698_v45  ;;  %v1716_v57 = vld [vmem:[%s1895_s2 + $0x18] sm:$0xff] (!%p1142_p6)  ;;  %v638_v0 = vld [vmem:[%s1896_s5] sm:$0xff] (!%p1142_p6) }
 0x134   : > { %v626_v54 = vmul.f32 (!%p1142_p6), %v1693_v44, %v1693_v44  ;;  %v627_v55 = vmul.f32 (!%p1142_p6), %v1698_v45, %v1698_v45  ;;  %v608_v3 = vmul.f32 (!%p1142_p6), 256.0, %v1711_v56  ;;  %v609_v4 = vmul.f32 (!%p1142_p6), 256.0, %v1716_v57  ;;  %1196 = vmatprep.mubr.msk.f32.mxu0 (!%p1142_p6), %vm642_vm4, %v638_v0  ;;  %1210 = vmatprep.mubr.msk.f32.mxu1 (!%p1142_p6), %vm642_vm4, %v638_v0 }
 0x135   : > { %v616_v8 = vmul.f32 (!%p1142_p6), 2.0, %v1711_v56  ;;  %v617_v15 = vmul.f32 (!%p1142_p6), 2.0, %v1716_v57  ;;  %v628_v17 = vmul.f32 (!%p1142_p6), %v1711_v56, %v1711_v56 }
 0x136   : > { %v630_v1 = vmul.f32 (!%p1142_p6), 256.0, %v626_v54  ;;  %v631_v2 = vmul.f32 (!%p1142_p6), 256.0, %v627_v55 }
 0x137   : > { %580 = vadd.xlane.f32.xlu1 %v573_v18  ;;  %578 = vadd.xlane.f32.xlu0 %v572_v19 }
 0x1b8   : > { %v554_v22 = vpop.xlane.xlu1 %553  ;;  %v550_v23 = vpop.xlane.xlu0 %549 }
 0x1b9   : > { %v559_v24 = vadd.f32 %v554_v22, %v547_v20  ;;  %v557_v25 = vadd.f32 %v550_v23, %v545_v21  ;;  %v629_v22 = vmul.f32 (!%p1142_p6), %v1716_v57, %v1716_v57 }
 0x1bb   : > { %564 = vst.msk [vmem:[#allocation2 + $0x10] sm:$0xff] %vm561_vm3, %v559_v24  ;;  %562 = vst.msk [vmem:[#allocation2] sm:$0xff] %vm561_vm3, %v557_v25  ;;  %v632_v25 = vmul.f32 (!%p1142_p6), 256.0, %v628_v17 }
 0x1bc   : > { %v556_v28 = vpop.xlane.xlu1 %555  ;;  %v552_v29 = vpop.xlane.xlu0 %551 }
 0x1bd   : > { %v560_v30 = vadd.f32 %v556_v28, %v548_v26  ;;  %v558_v31 = vadd.f32 %v552_v29, %v546_v27  ;;  %v633_v28 = vmul.f32 (!%p1142_p6), 256.0, %v629_v22 }
 0x1bf   : > { %565 = vst.msk [vmem:[#allocation2 + $0x18] sm:$0xff] %vm561_vm3, %v560_v30  ;;  %563 = vst.msk [vmem:[#allocation2 + $0x8] sm:$0xff] %vm561_vm3, %v558_v31 }
 0x1c0   : > { %v577_v34 = vpop.xlane.xlu1 %576  ;;  %v575_v35 = vpop.xlane.xlu0 %574 }
 0x1c1   : > { %v583_v36 = vadd.f32 %v577_v34, %v567_v32  ;;  %v582_v37 = vadd.f32 %v575_v35, %v566_v33  ;;  %593 = sbr.rel (%p1142_p6) target bundleno = 716 (0x2cc), region = 97  ;;  %v639_v32 = vld [vmem:[%s1896_s5 + $0x8] sm:$0xff] (!%p1142_p6)  ;;  %v640_v33 = vld [vmem:[%s1896_s5 + $0x10] sm:$0xff] (!%p1142_p6)  ;;  %v641_v35 = vld [vmem:[%s1896_s5 + $0x18] sm:$0xff] (!%p1142_p6) }
 0x1c2   : > { %v598_v46 = vld [vmem:[#allocation2] sm:$0xff] (!%p1142_p6)  ;;  %v600_v62 = vld [vmem:[#allocation2 + $0x10] sm:$0xff] (!%p1142_p6) }
 0x1c3   : > { %587 = vst.msk [vmem:[#allocation3 + $0x8] sm:$0xff] %vm561_vm3, %v583_v36  ;;  %586 = vst.msk [vmem:[#allocation3] sm:$0xff] %vm561_vm3, %v582_v37  ;;  %v610_v58 = vadd.f32 (!%p1142_p6), %v606_v48, %v598_v46  ;;  %v618_v60 = vmul.f32 (!%p1142_p6), %v614_v50, %v598_v46  ;;  %v612_v9 = vadd.f32 (!%p1142_p6), %v608_v3, %v600_v62 }
 0x1c4   : > { %v581_v40 = vpop.xlane.xlu1 %580  ;;  %v579_v41 = vpop.xlane.xlu0 %578  ;;  %v620_v20 = vmul.f32 (!%p1142_p6), %v616_v8, %v600_v62  ;;  %v854_v8 = vld [vmem:[%s1897_s3 + $0x8] sm:$0xff] (!%p1142_p6) }
 0x1c5   : > { %v585_v42 = vadd.f32 %v581_v40, %v569_v38  ;;  %v584_v43 = vadd.f32 %v579_v41, %v568_v39 }
 0x1c6   : > { %v599_v47 = vld [vmem:[#allocation2 + $0x8] sm:$0xff] (!%p1142_p6)  ;;  %v601_v63 = vld [vmem:[#allocation2 + $0x18] sm:$0xff] (!%p1142_p6) }
 0x1c7   : > { %589 = vst.msk [vmem:[#allocation3 + $0x18] sm:$0xff] %vm561_vm3, %v585_v42  ;;  %588 = vst.msk [vmem:[#allocation3 + $0x10] sm:$0xff] %vm561_vm3, %v584_v43  ;;  %v611_v59 = vadd.f32 (!%p1142_p6), %v607_v49, %v599_v47  ;;  %v619_v61 = vmul.f32 (!%p1142_p6), %v615_v51, %v599_v47  ;;  %v613_v10 = vadd.f32 (!%p1142_p6), %v609_v4, %v601_v63 }
 0x1c8   : > { %v621_v23 = vmul.f32 %v617_v15, %v601_v63 }
 0x1c9   : > { %v1216_v5 = vpack.c.bf16 %v611_v59, %v610_v58  ;;  %v1220_v24 = vpack.c.bf16 %v613_v10, %v612_v9  ;;  %v853_v9 = vld [vmem:[%s1897_s3] sm:$0xff] }
 0x1ca   : > { %v602_v52 = vld [vmem:[#allocation3] sm:$0xff]  ;;  %v603_v53 = vld [vmem:[#allocation3 + $0x8] sm:$0xff] }
 0x1cb   : > { %v622_v6 = vadd.f32 %v618_v60, %v602_v52  ;;  %v623_v7 = vadd.f32 %v619_v61, %v603_v53  ;;  %1217 = vmatprep.subr.bf16.mxu0 %v1216_v5 }
 0x1cc   : > { %1219 = vmatpush3.bf16.msra.mxu0 %v1216_v5 }
 0x1cd   : > { %v634_v18 = vadd.f32 %v630_v1, %v622_v6  ;;  %v635_v19 = vadd.f32 %v631_v2, %v623_v7  ;;  %1221 = vmatprep.subr.bf16.mxu0 %v1220_v24 }
 0x1ce   : > { %v604_v16 = vld [vmem:[#allocation3 + $0x10] sm:$0xff]  ;;  %v605_v21 = vld [vmem:[#allocation3 + $0x18] sm:$0xff] }
 0x1cf   : > { %v1224_v26 = vpack.c.bf16 %v635_v19, %v634_v18  ;;  %v624_v27 = vadd.f32 %v620_v20, %v604_v16  ;;  %v625_v29 = vadd.f32 %v621_v23, %v605_v21  ;;  %v874_v19 = vld [vmem:[%s1898_s10 + $0x8] sm:$0xff]  ;;  %v856_v21 = vld [vmem:[%s1897_s3 + $0x18] sm:$0xff]  ;;  %v873_v23 = vld [vmem:[%s1898_s10] sm:$0xff] }
 0x1d0   : > { %1223 = vmatpush3.bf16.msra.mxu0 %v1220_v24 }
 0x1d1   : > { %1225 = vmatprep.subr.bf16.mxu1 %v1224_v26  ;;  %v636_v30 = vadd.f32 %v632_v25, %v624_v27  ;;  %v637_v31 = vadd.f32 %v633_v28, %v625_v29 }
 0x1d2   : > { %1227 = vmatpush3.bf16.msra.mxu1 %v1224_v26 }
 0x1d3   : > { %v1228_v34 = vpack.c.bf16 %v637_v31, %v636_v30  ;;  %1197 = vmatmul.mubr.msk.f32.vlgmr.msra.gmra.mrb[0].mxu0 %vm642_vm4, %v639_v32  ;;  %v876_v31 = vld [vmem:[%s1898_s10 + $0x18] sm:$0xff] }
 0x1d4   : > { %1199 = vmatprep.mubr.msk.f32.mxu0 %vm642_vm4, %v640_v33 }
 0x1d5   : > { %1229 = vmatprep.subr.bf16.mxu1 %v1228_v34 }
 0x1d6   : > { %1231 = vmatpush3.bf16.msra.mxu1 %v1228_v34  ;;  %v875_v34 = vld [vmem:[%s1898_s10 + $0x10] sm:$0xff] }
 0x1d7   : > { %1200 = vmatmul.mubr.msk.f32.gmra.mrb[2].mxu0 %vm642_vm4, %v641_v35 }
 0x1d9   : > { %1211 = vmatmul.mubr.msk.f32.vlgmr.msra.gmra.mrb[0].mxu1 %vm642_vm4, %v639_v32 }
 0x1da   : > { %1213 = vmatprep.mubr.msk.f32.mxu1 %vm642_vm4, %v640_v33 }
 0x1dd   : > { %1214 = vmatmul.mubr.msk.f32.gmra.mrb[2].mxu1 %vm642_vm4, %v641_v35 }
 0x2a6   : > { %v1198_v36 = vpop.f32.mrb[0].mxu0 }
 0x2a7   : > { %v741_v37 = vmul.f32 0.001953125, %v1198_v36  ;;  %v721_v38 = vpop.f32.mrb[1].mxu0 }
 0x2a8   : > { %v740_v39 = vmul.f32 0.001953125, %v721_v38 }
 0x2a9   : > { %v834_v40 = vmul.f32 %v741_v37, %v741_v37  ;;  %v866_v16 = vsub.f32 %v1698_v45, %v741_v37 }
 0x2aa   : > { %v1201_v41 = vpop.f32.mrb[2].mxu0  ;;  %v833_v42 = vmul.f32 %v740_v39, %v740_v39  ;;  %v865_v18 = vsub.f32 %v1693_v44, %v740_v39  ;;  %v855_v44 = vld [vmem:[%s1897_s3 + $0x10] sm:$0xff] }
 0x2ab   : > { %v743_v46 = vmul.f32 0.001953125, %v1201_v41  ;;  %v731_v47 = vpop.f32.mrb[3].mxu0 }
 0x2ac   : > { %v1212_v43 = vpop.f32.mrb[0].mxu1  ;;  %v742_v50 = vmul.f32 0.001953125, %v731_v47 }
 0x2ad   : > { %v830_v48 = vmul.f32 0.001953125, %v1212_v43  ;;  %v810_v49 = vpop.f32.mrb[1].mxu1  ;;  %v836_v53 = vmul.f32 %v743_v46, %v743_v46  ;;  %v868_v27 = vsub.f32 %v1716_v57, %v743_v46 }
 0x2ae   : > { %v829_v51 = vmul.f32 0.001953125, %v810_v49  ;;  %v835_v55 = vmul.f32 %v742_v50, %v742_v50  ;;  %v867_v30 = vsub.f32 %v1711_v56, %v742_v50 }
 0x2af   : > { %v838_v52 = vsub.f32 %v830_v48, %v834_v40 }
 0x2b0   : > { %v837_v54 = vsub.f32 %v829_v51, %v833_v42  ;;  %v1215_v58 = vpop.f32.mrb[2].mxu1 }
 0x2b1   : > { %v842_v59 = vmax.f32 %v838_v52, 0.0  ;;  %v832_v60 = vmul.f32 0.001953125, %v1215_v58  ;;  %v820_v61 = vpop.f32.mrb[3].mxu1 }
 0x2b2   : > { %v841_v62 = vmax.f32 %v837_v54, 0.0  ;;  %v831_v63 = vmul.f32 0.001953125, %v820_v61 }
 0x2b3   : > { %v846_v0 = vadd.f32 1e-05, %v842_v59  ;;  %v840_v1 = vsub.f32 %v832_v60, %v836_v53 }
 0x2b4   : > { %v845_v2 = vadd.f32 1e-05, %v841_v62  ;;  %v839_v3 = vsub.f32 %v831_v63, %v835_v55 }
 0x2b5   : > { %1349 = vrsqrt.f32 %v846_v0  ;;  %v844_v4 = vmax.f32 %v840_v1, 0.0 }
 0x2b6   : > { %1351 = vrsqrt.f32 %v845_v2  ;;  %v843_v5 = vmax.f32 %v839_v3, 0.0 }
 0x2b7   : > { %v848_v6 = vadd.f32 1e-05, %v844_v4 }
 0x2b8   : > { %v847_v7 = vadd.f32 1e-05, %v843_v5 }
 0x2b9   : > { %1353 = vrsqrt.f32 %v848_v6 }
 0x2ba   : > { %1355 = vrsqrt.f32 %v847_v7 }
 0x2bf   : > { %v1350_v10 = vpop.eup %1349 }
 0x2c0   : > { %v1352_v15 = vpop.eup %1351  ;;  %v858_v17 = vmul.f32 %v1350_v10, %v854_v8 }
 0x2c1   : > { %v857_v20 = vmul.f32 %v1352_v15, %v853_v9 }
 0x2c2   : > { %862 = vst.msk [vmem:[#allocation4 + $0x8] sm:$0xff] %vm561_vm3, %v858_v17  ;;  %v870_v22 = vmul.f32 %v866_v16, %v858_v17 }
 0x2c3   : > { %v1354_v45 = vpop.eup %1353  ;;  %861 = vst.msk [vmem:[#allocation4] sm:$0xff] %vm561_vm3, %v857_v20  ;;  %v869_v24 = vmul.f32 %v865_v18, %v857_v20 }
 0x2c4   : > { %v1356_v25 = vpop.eup %1355  ;;  %v878_v26 = vadd.f32 %v874_v19, %v870_v22  ;;  %v860_v28 = vmul.f32 %v1354_v45, %v856_v21 }
 0x2c5   : > { %v877_v29 = vadd.f32 %v873_v23, %v869_v24  ;;  %v859_v32 = vmul.f32 %v1356_v25, %v855_v44 }
 0x2c6   : > { %882 = vst.msk [vmem:[#allocation5 + $0x8] sm:$0xff] %vm561_vm3, %v878_v26  ;;  %864 = vst.msk [vmem:[#allocation4 + $0x18] sm:$0xff] %vm561_vm3, %v860_v28  ;;  %v872_v33 = vmul.f32 %v868_v27, %v860_v28 }
 0x2c7   : > { %881 = vst.msk [vmem:[#allocation5] sm:$0xff] %vm561_vm3, %v877_v29  ;;  %863 = vst.msk [vmem:[#allocation4 + $0x10] sm:$0xff] %vm561_vm3, %v859_v32  ;;  %v871_v57 = vmul.f32 %v867_v30, %v859_v32 }
 0x2c8   : > { %v880_v56 = vadd.f32 %v876_v31, %v872_v33 }
 0x2c9   : > { %v879_v35 = vadd.f32 %v875_v34, %v871_v57 }
 0x2ca   : > { %884 = vst.msk [vmem:[#allocation5 + $0x18] sm:$0xff] %vm561_vm3, %v880_v56 }
 0x2cb   : > { %883 = vst.msk [vmem:[#allocation5 + $0x10] sm:$0xff] %vm561_vm3, %v879_v35 }
 0x2cc PF: > { %p1151_p7 = scmp.ne.s32.totalorder %s1465_s27, 1 }
 0x2cd   : > { %v889_v37 = vld [vmem:[#allocation4] sm:$0xff] (!%p1151_p7)  ;;  %v1488_v38 = vmov (!%p1151_p7), 0   ;;  %v892_v39 = vld [vmem:[#allocation4 + $0x18] sm:$0xff] (!%p1151_p7)  ;;  %v890_v40 = vld [vmem:[#allocation4 + $0x8] sm:$0xff] (!%p1151_p7) }
 0x2ce   : > { %888 = sbr.rel (%p1151_p7) target bundleno = 862 (0x35e), region = 101  ;;  %v891_v36 = vld [vmem:[#allocation4 + $0x10] sm:$0xff] (!%p1151_p7)  ;;  %1358 = vset.pattern.permute.xlu1 (!%p1151_p7), %v1488_v38  ;;  %1357 = vset.pattern.permute.xlu0 (!%p1151_p7), %v1488_v38  ;;  %v918_v41 = vld [vmem:[#allocation5 + $0x8] sm:$0xff] (!%p1151_p7)  ;;  %v917_v42 = vld [vmem:[#allocation5] sm:$0xff] (!%p1151_p7) }
 0x2cf   : > { %905 = vperm.xlu1 (!%p1151_p7), %1358, %v891_v36   ;;  %895 = vperm.xlu0 (!%p1151_p7), %1357, %v889_v37  }
 0x2d1   : > { %v920_v43 = vld [vmem:[#allocation5 + $0x18] sm:$0xff] (!%p1151_p7) }
 0x2d2   : > { %v919_v46 = vld [vmem:[#allocation5 + $0x10] sm:$0xff] (!%p1151_p7) }
 0x2d3   : > { %910 = vperm.xlu1 (!%p1151_p7), %1358, %v892_v39   ;;  %900 = vperm.xlu0 (!%p1151_p7), %1357, %v890_v40  }
 0x2d7   : > { %928 = vperm.xlu1 %1358, %v918_v41   ;;  %923 = vperm.xlu0 %1357, %v917_v42  }
 0x2db   : > { %938 = vperm.xlu1 %1358, %v920_v43   ;;  %933 = vperm.xlu0 %1357, %v919_v46  }
 0x34e   : > { %v906_v47 = vpop.permute.xlu1 %905  ;;  %v896_v48 = vpop.permute.xlu0 %895 }
 0x34f   : > { %v913_v51 = vmul.f32 %v896_v48, %v1659_v12  ;;  %v915_v59 = vmul.f32 %v1657_v11, %v906_v47 }
 0x352   : > { %v911_v49 = vpop.permute.xlu1 %910  ;;  %v901_v50 = vpop.permute.xlu0 %900 }
 0x353   : > { %v914_v52 = vmul.f32 %v901_v50, %v1663_v14  ;;  %v916_v60 = vmul.f32 %v1661_v13, %v911_v49 }
 0x356   : > { %v929_v53 = vpop.permute.xlu1 %928  ;;  %v924_v54 = vpop.permute.xlu0 %923 }
 0x357   : > { %v942_v55 = vadd.f32 %v929_v53, %v914_v52  ;;  %v941_v58 = vadd.f32 %v924_v54, %v913_v51 }
 0x359   : > { %946 = vst [vmem:[%s1665_s14 + $0x8] sm:$0xff] %v942_v55  ;;  %945 = vst [vmem:[%s1665_s14] sm:$0xff] %v941_v58 }
 0x35a   : > { %v939_v61 = vpop.permute.xlu1 %938  ;;  %v934_v62 = vpop.permute.xlu0 %933 }
 0x35b   : > { %v944_v63 = vadd.f32 %v939_v61, %v916_v60  ;;  %v943_v0 = vadd.f32 %v934_v62, %v915_v59 }
 0x35d   : > { %948 = vst [vmem:[%s1665_s14 + $0x18] sm:$0xff] %v944_v63  ;;  %947 = vst [vmem:[%s1665_s14 + $0x10] sm:$0xff] %v943_v0 }
 0x35e PF: > { %s1899_s24 = sld [smem:[#allocation10_spill]]  ;;  %s957_s19 = smul.u32 %s1461_s26, %s1465_s27 }
 0x35f   : > { %s968_s16 = sshll.u32 %s1665_s14, 4  ;;  %s1900_s30 = sld [smem:[#allocation19_spill]]  ;;  %s1795_s16 = int_to_ptr.vmem [resolvable:$true] %s968_s16 }
 0x360   : > { %s1902_s2 = sand.u32 1, %s1445_s22   ;;  %s1359_s5 = scalar_lea.vmem %s1795_s16, 512 }
 0x361   : > { %s1804_s3 = scalar_lea.sflag [#allocation8], %s1902_s2  ;;  %p1360_p8 = scmp.ne.s32.totalorder %s1795_s16, %s1359_s5 }
 0x362   : > { %s1489_s26 = smov [#allocation7]  }
 0x363   : > { %p1361_p10 = pnand %p1360_p8, %p1619_p9  ;;  %s1363_s27 = sshll.u32 %s1489_s26, 4  ;;  %s1364_s27 = int_to_ptr.vmem [resolvable:$false] %s1363_s27 }
 0x364   : > { %s1153_s6 = sshll.u32 %s1899_s24, 3  ;;  %s1365_s14 = scalar_lea.vmem %s1364_s27, 1024 }
 0x365   : > { %s965_s28 = sadd.s32 %s1153_s6, %s957_s19  ;;  %s1901_s0 = smov %s1900_s30 }
 0x366   : > { %s1154_s4 = sshll.u32 %s965_s28, 7  ;;  %p1362_p11 = pneg %p1361_p10 }
 0x367   : > { %s1800_s1 = scalar_lea.hbm %s1900_s30, %s1154_s4  ;;  %p1366_p12 = scmp.lt.s32.totalorder %s1795_s16, %s1364_s27 }
 0x368   : > { %p1367_p0 = scmp.lt.s32.totalorder %s1365_s14, %s1359_s5 }
 0x36a   : > { %p1368_p1 = por %p1367_p0, %p1366_p12 }
 0x36c   : > { %p1369_p2 = pnand %p1368_p1, %p1362_p11 }
 0x36e   : > { %1372 = shalt.err (!%p1369_p2)
}
 0x36f   : > { %s1373_s2 = scalar_lea.hbm %s1800_s1, 512  ;;  %s1377_s19 = scalar_lea.hbm %s1901_s0, 2048 }
 0x370   : > { %p1374_p3 = scmp.ne.s32.totalorder %s1800_s1, %s1373_s2  ;;  %p1378_p6 = scmp.lt.u32.totalorder %s1800_s1, %s1901_s0 }
 0x371   : > { %p1379_p7 = scmp.lt.u32.totalorder %s1377_s19, %s1373_s2  ;;  %p1381_p10 = scmp.lt.u32.totalorder %s1373_s2, %s1800_s1 }
 0x372   : > { %p1375_p4 = pnand %p1374_p3, %p1619_p9 }
 0x373   : > { %p1380_p8 = por %p1379_p7, %p1378_p6 }
 0x374   : > { %p1376_p5 = pneg %p1375_p4 }
 0x375   : > { %p1382_p11 = por %p1381_p10, %p1380_p8 }
 0x377   : > { %p1383_p12 = pnand %p1382_p11, %p1376_p5 }
 0x379   : > { %1386 = shalt.err (!%p1383_p12)
}
 0x37a   : > { %s1490_s5 = smov 128   ;;  %s1491_s4 = smov 256  }
 0x37b   : > { %s1492_s15 = smov 8  }
 0x37c   : > { %1236 = dma.vmem_to_hbm [thread:$0]  (%p1619_p9), %s1795_s16, 512, %s1800_s1, %s1804_s3, %s1490_s5, %s1491_s4, %s1492_s15  }
 0x37d PF: > { %p1242_p0 = scmp.ge.s32.totalorder %s1485_s8, 2  ;;  %s983_s18 = sand.u32 1, %s1441_s21  }
 0x37e   : > { %s984_s26 = scalar_lea.sflag [#allocation8], %s983_s18 }
 0x37f   : > { %p1239_p1 = pnand %p1242_p0, %p1626_p13 }
 0x381   : > { %1436 = dma.done.wait (!%p1239_p1), %s984_s26, 512  }
 0x382   : > { %1438 = vsyncadd (!%p1239_p1), %s984_s26, 4294966784  ;;  %s19_s8 = sadd.s32 1, %s1485_s8   ;;  %s1903_s27 = sld [smem:[#allocation11_spill]] }
 0x383   : > { %p16_p2 = scmp.ge.s32.totalorder %s19_s8, 10   ;;  %s1904_s30 = sld [smem:[#allocation12_spill]] }
 0x384   : > { %s1905_s21 = smov %s1445_s22  ;;  %s1906_s22 = smov %s1449_s23 }
 0x385   : > { %s1907_s23 = smov %s1634_s17  ;;  %s1908_s24 = smov %s1457_s25 }
 0x386   : > { %s1909_s25 = smov %s1631_s9  ;;  %s1910_s26 = smov %s1473_s29 }
 0x387   : > { %s1911_s28 = smov %s1481_s7  ;;  %s1912_s29 = smov %s1915_s11 }
 0x388   : > { %s1913_s7 = smov %s1923_s13  ;;  %18 = sbr.rel (!%p16_p2) target bundleno = 15 (0xf), region = 153 }
 0x38f   :  { %989 = vsyncpa [#allocation8], 1 }
 0x390   :  { %991 = vsyncpa [#allocation8 + $0x1], 1 }

</bundles_post_ra>
